<compile_context>
chip_gen: v6e
topology: v6e:2x2x1
jax: 0.10.0
libtpu: 0.0.40
codegen_flags: <defaults>
</compile_context>

<pallas_src>
import math
import jax
import jax.numpy as jnp
from jax.experimental import pallas as pl
from jax.experimental.pallas import tpu as pltpu


def mlp_policy_kernel(obs_ref, w1_ref, b1_ref, w2_ref, b2_ref, w3_ref, b3_ref,
                      std_ref, eps_ref, logp_const_ref, out_ref):
    x = obs_ref[...]                                                     # (TB, obs_dim)

    # mean_net: Linear -> tanh -> Linear -> tanh -> Linear (MXU matmuls, EUP tanh)
    h1 = jnp.tanh(jnp.dot(x, w1_ref[...],
                          preferred_element_type=jnp.float32) + b1_ref[...])
    h2 = jnp.tanh(jnp.dot(h1, w2_ref[...],
                          preferred_element_type=jnp.float32) + b2_ref[...])
    mean = jnp.dot(h2, w3_ref[...],
                   preferred_element_type=jnp.float32) + b3_ref[...]     # (TB, ac_dim)

    # MultivariateNormal with scale_tril = diag(std); rsample() = mean + std * eps
    std = std_ref[...]                                                   # (1, ac_dim)
    eps = eps_ref[...]                                                   # (TB, ac_dim)
    action = mean + std * eps

    # log_prob of the reparameterized sample: (action - mean)/std == eps exactly,
    # so no subtract/divide needed. Batch-invariant constant comes from SMEM.
    logp = (-0.5 * jnp.sum(eps * eps, axis=-1, keepdims=True)
            + logp_const_ref[0, 0])                                      # (TB, 1)

    # Pack into one lane-dense output slab: [mean | action | logp | zero pad].
    ac_dim = mean.shape[-1]
    out_ref[...] = jnp.zeros_like(out_ref)          # full-width unmasked store (pad = 0)
    out_ref[:, 0:ac_dim] = mean
    out_ref[:, ac_dim:2 * ac_dim] = action
    out_ref[:, 2 * ac_dim:2 * ac_dim + 1] = logp


# Keep streamed double-buffered tiles well under v7x's default 32 MiB scoped VMEM.
_VMEM_STREAM_BUDGET_BYTES = 24 * 1024 * 1024


def _pick_tile_b(B, requested, obs_dim, ac_dim, out_cols):
    """Choose a batch tile: big (amortize ~0.35us/step + fill MXU M), VMEM-safe,
    multiple of 8 sublanes, and leaving >= 2 grid steps for megacore when possible."""
    t = max(8, min(requested, B))
    t = (t // 8) * 8

    def stream_bytes(tb):  # double-buffered obs + eps in, packed slab out (f32)
        return 2 * tb * (obs_dim + ac_dim + out_cols) * 4

    while t > 8 and stream_bytes(t) > _VMEM_STREAM_BUDGET_BYTES:
        t = max(8, (t // 2 // 8) * 8)

    # Prefer grid length >= 2 so dimension_semantics=("parallel",) can spread work
    # across v7x's 2 TensorCores.
    if -(-B // t) < 2 and t > 8:
        t = max(8, (t // 2 // 8) * 8)
    return t


def mlp_policy_forward(obs, params, eps, *, tile_b=512):
    """Returns (mean, action, log_prob). obs: [B, obs_dim] float32, eps: [B, ac_dim]."""
    w1, b1, w2, b2, w3, b3, logstd = params
    B, obs_dim = obs.shape
    H1 = w1.shape[1]
    H2 = w2.shape[1]
    ac_dim = w3.shape[1]

    out_cols = ((2 * ac_dim + 1 + 127) // 128) * 128      # lane-dense packed slab width
    tile_b = _pick_tile_b(B, tile_b, obs_dim, ac_dim, out_cols)

    n_tiles = -(-B // tile_b)
    B_pad = n_tiles * tile_b
    if B_pad != B:
        pad = B_pad - B
        obs = jnp.pad(obs, ((0, pad), (0, 0)))
        eps = jnp.pad(eps, ((0, pad), (0, 0)))

    # Batch-invariant precompute (done once, not per grid step):
    std = jnp.exp(logstd).astype(jnp.float32)                            # (1, ac_dim)
    logp_const = (-(jnp.sum(logstd) + 0.5 * ac_dim * math.log(2.0 * math.pi))
                  .astype(jnp.float32).reshape(1, 1))                    # (1, 1) SMEM scalar

    rep = lambda i: (0, 0)   # parameters stay VMEM-resident across batch tiles

    packed = pl.pallas_call(
        mlp_policy_kernel,
        out_shape=jax.ShapeDtypeStruct((B_pad, out_cols), jnp.float32),
        grid_spec=pltpu.PrefetchScalarGridSpec(
            num_scalar_prefetch=0,
            grid=(n_tiles,),
            in_specs=[
                pl.BlockSpec((tile_b, obs_dim), lambda i: (i, 0)),       # obs
                pl.BlockSpec((obs_dim, H1), rep),                        # w1
                pl.BlockSpec((1, H1), rep),                              # b1
                pl.BlockSpec((H1, H2), rep),                             # w2
                pl.BlockSpec((1, H2), rep),                              # b2
                pl.BlockSpec((H2, ac_dim), rep),                         # w3
                pl.BlockSpec((1, ac_dim), rep),                          # b3
                pl.BlockSpec((1, ac_dim), rep),                          # std
                pl.BlockSpec((tile_b, ac_dim), lambda i: (i, 0)),        # eps
                pl.BlockSpec(memory_space=pltpu.MemorySpace.SMEM),       # logp const
            ],
            out_specs=pl.BlockSpec((tile_b, out_cols), lambda i: (i, 0)),
        ),
        compiler_params=pltpu.CompilerParams(
            dimension_semantics=("parallel",)),
    )(obs, w1, b1, w2, b2, w3, b3, std, eps, logp_const)

    mean = packed[:B, 0:ac_dim]
    action = packed[:B, ac_dim:2 * ac_dim]
    logp = packed[:B, 2 * ac_dim:2 * ac_dim + 1]
    return mean, action, logp


def reference_forward(obs, params, eps):
    w1, b1, w2, b2, w3, b3, logstd = params
    h1 = jnp.tanh(obs @ w1 + b1)
    h2 = jnp.tanh(h1 @ w2 + b2)
    mean = h2 @ w3 + b3
    std = jnp.exp(logstd)
    action = mean + std * eps
    ac_dim = mean.shape[-1]
    z = (action - mean) / std
    logp = (-0.5 * jnp.sum(z * z, axis=-1, keepdims=True)
            - jnp.sum(logstd, axis=-1, keepdims=True)
            - 0.5 * ac_dim * math.log(2.0 * math.pi))
    return mean, action, logp


def _make_inputs(key, B, OBS, H, AC):
    k_obs, k_w1, k_w2, k_w3, k_eps, k_ls = jax.random.split(key, 6)
    obs = jax.random.normal(k_obs, (B, OBS), dtype=jnp.float32)
    eps = jax.random.normal(k_eps, (B, AC), dtype=jnp.float32)   # rsample noise
    w1 = jax.random.normal(k_w1, (OBS, H), dtype=jnp.float32) * (1.0 / math.sqrt(OBS))
    b1 = jnp.zeros((1, H), dtype=jnp.float32)
    w2 = jax.random.normal(k_w2, (H, H), dtype=jnp.float32) * (1.0 / math.sqrt(H))
    b2 = jnp.zeros((1, H), dtype=jnp.float32)
    w3 = jax.random.normal(k_w3, (H, AC), dtype=jnp.float32) * (1.0 / math.sqrt(H))
    b3 = jnp.zeros((1, AC), dtype=jnp.float32)
    # nn.Parameter(torch.zeros(ac_dim)) in __init__; perturb slightly so std != 1 path is tested
    logstd = 0.1 * jax.random.normal(k_ls, (1, AC), dtype=jnp.float32)
    return obs, eps, (w1, b1, w2, b2, w3, b3, logstd)


if __name__ == "__main__":
    # Small shapes consistent with the module: obs_dim=16, hidden=32, ac_dim=8.
    key = jax.random.PRNGKey(0)
    k_a, k_b = jax.random.split(key)

    # Case 1: batch divisible by the chosen tile.
    obs, eps, params = _make_inputs(k_a, 256, 16, 32, 8)
    mean, action, logp = mlp_policy_forward(obs, params, eps)
    jax.block_until_ready((mean, action, logp))
    mean_r, action_r, logp_r = reference_forward(obs, params, eps)
    assert jnp.allclose(mean, mean_r, atol=1e-5, rtol=1e-5)
    assert jnp.allclose(action, action_r, atol=1e-5, rtol=1e-5)
    assert jnp.allclose(logp, logp_r, atol=1e-4, rtol=1e-5)

    # Case 2: ragged batch (exercises the zero-padding path).
    obs2, eps2, params2 = _make_inputs(k_b, 100, 16, 32, 8)
    mean2, action2, logp2 = mlp_policy_forward(obs2, params2, eps2)
    jax.block_until_ready((mean2, action2, logp2))
    mean2_r, action2_r, logp2_r = reference_forward(obs2, params2, eps2)
    assert jnp.allclose(mean2, mean2_r, atol=1e-5, rtol=1e-5)
    assert jnp.allclose(action2, action2_r, atol=1e-5, rtol=1e-5)
    assert jnp.allclose(logp2, logp2_r, atol=1e-4, rtol=1e-5)

    # TODO(synk): discrete Categorical branch and optimizer/update/save logic are not part
    # of the forward hot path and are not implemented here. eps is kept as an input (rather
    # than in-kernel pltpu.prng_* generation) so results are exactly reproducible vs the ref.
    print("KERNEL_OK")
</pallas_src>

<mosaic_0001>
module attributes {stable_mosaic.version = 11 : i64} {
  func.func @mlp_policy_kernel(%arg0: i32, %arg1: memref<128x16xf32, #tpu.memory_space<vmem>>, %arg2: memref<16x32xf32, #tpu.memory_space<vmem>>, %arg3: memref<1x32xf32, #tpu.memory_space<vmem>>, %arg4: memref<32x32xf32, #tpu.memory_space<vmem>>, %arg5: memref<1x32xf32, #tpu.memory_space<vmem>>, %arg6: memref<32x8xf32, #tpu.memory_space<vmem>>, %arg7: memref<1x8xf32, #tpu.memory_space<vmem>>, %arg8: memref<1x8xf32, #tpu.memory_space<vmem>>, %arg9: memref<128x8xf32, #tpu.memory_space<vmem>>, %arg10: memref<1x1xf32, #tpu.memory_space<smem>>, %arg11: memref<128x128xf32, #tpu.memory_space<vmem>>) attributes {dimension_semantics = [#tpu.dimension_semantics<parallel>], iteration_bounds = array<i64: 2>, scalar_prefetch = 0 : i64, scratch_operands = 0 : i64, tpu.core_type = #tpu.core_type<tc>, window_params = [{transform_indices = @transform_0, window_bounds = array<i64: 128, 16>}, {pipeline_mode = #tpu.pipeline_mode<synchronous>, transform_indices = @transform_1, window_bounds = array<i64: 16, 32>}, {pipeline_mode = #tpu.pipeline_mode<synchronous>, transform_indices = @transform_2, window_bounds = array<i64: 1, 32>}, {pipeline_mode = #tpu.pipeline_mode<synchronous>, transform_indices = @transform_3, window_bounds = array<i64: 32, 32>}, {pipeline_mode = #tpu.pipeline_mode<synchronous>, transform_indices = @transform_4, window_bounds = array<i64: 1, 32>}, {pipeline_mode = #tpu.pipeline_mode<synchronous>, transform_indices = @transform_5, window_bounds = array<i64: 32, 8>}, {pipeline_mode = #tpu.pipeline_mode<synchronous>, transform_indices = @transform_6, window_bounds = array<i64: 1, 8>}, {pipeline_mode = #tpu.pipeline_mode<synchronous>, transform_indices = @transform_7, window_bounds = array<i64: 1, 8>}, {transform_indices = @transform_8, window_bounds = array<i64: 128, 8>}, {transform_indices = @transform_9, window_bounds = array<i64: 1, 1>}, {transform_indices = @transform_10, window_bounds = array<i64: 128, 128>}]} {
    %c0 = arith.constant 0 : index
    %c0_0 = arith.constant 0 : index
    %0 = vector.load %arg1[%c0, %c0_0] : memref<128x16xf32, #tpu.memory_space<vmem>>, vector<128x16xf32>
    %c0_1 = arith.constant 0 : index
    %c0_2 = arith.constant 0 : index
    %1 = vector.load %arg2[%c0_1, %c0_2] : memref<16x32xf32, #tpu.memory_space<vmem>>, vector<16x32xf32>
    %cst = arith.constant dense<0.000000e+00> : vector<128x32xf32>
    %2 = tpu.matmul %0, %1, %cst {dimension_numbers = #tpu.dot_dimension_numbers<[1], [0], [0], [1], [0, 0, 1, 1], [], []>} : vector<128x16xf32>, vector<16x32xf32>, vector<128x32xf32> -> vector<128x32xf32>
    %c0_3 = arith.constant 0 : index
    %c0_4 = arith.constant 0 : index
    %3 = vector.load %arg3[%c0_3, %c0_4] : memref<1x32xf32, #tpu.memory_space<vmem>>, vector<1x32xf32>
    %4 = vector.broadcast %3 : vector<1x32xf32> to vector<128x32xf32>
    %5 = arith.addf %2, %4 : vector<128x32xf32>
    %6 = math.tanh %5 : vector<128x32xf32>
    %c0_5 = arith.constant 0 : index
    %c0_6 = arith.constant 0 : index
    %7 = vector.load %arg4[%c0_5, %c0_6] : memref<32x32xf32, #tpu.memory_space<vmem>>, vector<32x32xf32>
    %cst_7 = arith.constant dense<0.000000e+00> : vector<128x32xf32>
    %8 = tpu.matmul %6, %7, %cst_7 {dimension_numbers = #tpu.dot_dimension_numbers<[1], [0], [0], [1], [0, 0, 1, 1], [], []>} : vector<128x32xf32>, vector<32x32xf32>, vector<128x32xf32> -> vector<128x32xf32>
    %c0_8 = arith.constant 0 : index
    %c0_9 = arith.constant 0 : index
    %9 = vector.load %arg5[%c0_8, %c0_9] : memref<1x32xf32, #tpu.memory_space<vmem>>, vector<1x32xf32>
    %10 = vector.broadcast %9 : vector<1x32xf32> to vector<128x32xf32>
    %11 = arith.addf %8, %10 : vector<128x32xf32>
    %12 = math.tanh %11 : vector<128x32xf32>
    %c0_10 = arith.constant 0 : index
    %c0_11 = arith.constant 0 : index
    %13 = vector.load %arg6[%c0_10, %c0_11] : memref<32x8xf32, #tpu.memory_space<vmem>>, vector<32x8xf32>
    %cst_12 = arith.constant dense<0.000000e+00> : vector<128x8xf32>
    %14 = tpu.matmul %12, %13, %cst_12 {dimension_numbers = #tpu.dot_dimension_numbers<[1], [0], [0], [1], [0, 0, 1, 1], [], []>} : vector<128x32xf32>, vector<32x8xf32>, vector<128x8xf32> -> vector<128x8xf32>
    %c0_13 = arith.constant 0 : index
    %c0_14 = arith.constant 0 : index
    %15 = vector.load %arg7[%c0_13, %c0_14] : memref<1x8xf32, #tpu.memory_space<vmem>>, vector<1x8xf32>
    %16 = vector.broadcast %15 : vector<1x8xf32> to vector<128x8xf32>
    %17 = arith.addf %14, %16 : vector<128x8xf32>
    %c0_15 = arith.constant 0 : index
    %c0_16 = arith.constant 0 : index
    %18 = vector.load %arg8[%c0_15, %c0_16] : memref<1x8xf32, #tpu.memory_space<vmem>>, vector<1x8xf32>
    %c0_17 = arith.constant 0 : index
    %c0_18 = arith.constant 0 : index
    %19 = vector.load %arg9[%c0_17, %c0_18] : memref<128x8xf32, #tpu.memory_space<vmem>>, vector<128x8xf32>
    %20 = vector.broadcast %18 : vector<1x8xf32> to vector<128x8xf32>
    %21 = arith.mulf %20, %19 : vector<128x8xf32>
    %22 = arith.addf %17, %21 : vector<128x8xf32>
    %23 = arith.mulf %19, %19 : vector<128x8xf32>
    %cst_19 = arith.constant dense<0.000000e+00> : vector<128xf32>
    %24 = vector.multi_reduction <add>, %23, %cst_19 [1] : vector<128x8xf32> to vector<128xf32>
    %25 = vector.shape_cast %24 : vector<128xf32> to vector<128x1xf32>
    %cst_20 = arith.constant -5.000000e-01 : f32
    %26 = vector.broadcast %cst_20 : f32 to vector<128x1xf32>
    %27 = arith.mulf %26, %25 : vector<128x1xf32>
    %c0_21 = arith.constant 0 : index
    %c0_22 = arith.constant 0 : index
    %28 = memref.load %arg10[%c0_21, %c0_22] : memref<1x1xf32, #tpu.memory_space<smem>>
    %29 = vector.broadcast %28 : f32 to vector<128x1xf32>
    %30 = arith.addf %27, %29 : vector<128x1xf32>
    %cst_23 = arith.constant 0.000000e+00 : f32
    %31 = vector.broadcast %cst_23 : f32 to vector<128x128xf32>
    %c0_24 = arith.constant 0 : index
    %c0_25 = arith.constant 0 : index
    %32 = vector.load %arg11[%c0_24, %c0_25] : memref<128x128xf32, #tpu.memory_space<vmem>>, vector<128x128xf32>
    tpu.vector_store %arg11[%c0_24, %c0_25], %31 {strides = array<i32>} : memref<128x128xf32, #tpu.memory_space<vmem>>, vector<128x128xf32>,
    %c0_26 = arith.constant 0 : index
    %c0_27 = arith.constant 0 : index
    %33 = vector.load %arg11[%c0_26, %c0_27] : memref<128x128xf32, #tpu.memory_space<vmem>>, vector<128x8xf32>
    tpu.vector_store %arg11[%c0_26, %c0_27], %17 {strides = array<i32>} : memref<128x128xf32, #tpu.memory_space<vmem>>, vector<128x8xf32>,
    %c0_28 = arith.constant 0 : index
    %c8 = arith.constant 8 : index
    %34 = vector.load %arg11[%c0_28, %c8] : memref<128x128xf32, #tpu.memory_space<vmem>>, vector<128x8xf32>
    tpu.vector_store %arg11[%c0_28, %c8], %22 {strides = array<i32>} : memref<128x128xf32, #tpu.memory_space<vmem>>, vector<128x8xf32>,
    %c0_29 = arith.constant 0 : index
    %c16 = arith.constant 16 : index
    %35 = vector.load %arg11[%c0_29, %c16] : memref<128x128xf32, #tpu.memory_space<vmem>>, vector<128x1xf32>
    tpu.vector_store %arg11[%c0_29, %c16], %30 {strides = array<i32>} : memref<128x128xf32, #tpu.memory_space<vmem>>, vector<128x1xf32>,
    return
  }
  func.func @transform_0(%arg0: i32) -> (i32, i32) {
    %c0_i32 = arith.constant 0 : i32
    %c0_i32_0 = arith.constant 0 : i32
    return %arg0, %c0_i32 : i32, i32
  }
  func.func @transform_1(%arg0: i32) -> (i32, i32) {
    %c0_i32 = arith.constant 0 : i32
    %c0_i32_0 = arith.constant 0 : i32
    %c0_i32_1 = arith.constant 0 : i32
    return %c0_i32, %c0_i32_0 : i32, i32
  }
  func.func @transform_2(%arg0: i32) -> (i32, i32) {
    %c0_i32 = arith.constant 0 : i32
    %c0_i32_0 = arith.constant 0 : i32
    %c0_i32_1 = arith.constant 0 : i32
    return %c0_i32, %c0_i32_0 : i32, i32
  }
  func.func @transform_3(%arg0: i32) -> (i32, i32) {
    %c0_i32 = arith.constant 0 : i32
    %c0_i32_0 = arith.constant 0 : i32
    %c0_i32_1 = arith.constant 0 : i32
    return %c0_i32, %c0_i32_0 : i32, i32
  }
  func.func @transform_4(%arg0: i32) -> (i32, i32) {
    %c0_i32 = arith.constant 0 : i32
    %c0_i32_0 = arith.constant 0 : i32
    %c0_i32_1 = arith.constant 0 : i32
    return %c0_i32, %c0_i32_0 : i32, i32
  }
  func.func @transform_5(%arg0: i32) -> (i32, i32) {
    %c0_i32 = arith.constant 0 : i32
    %c0_i32_0 = arith.constant 0 : i32
    %c0_i32_1 = arith.constant 0 : i32
    return %c0_i32, %c0_i32_0 : i32, i32
  }
  func.func @transform_6(%arg0: i32) -> (i32, i32) {
    %c0_i32 = arith.constant 0 : i32
    %c0_i32_0 = arith.constant 0 : i32
    %c0_i32_1 = arith.constant 0 : i32
    return %c0_i32, %c0_i32_0 : i32, i32
  }
  func.func @transform_7(%arg0: i32) -> (i32, i32) {
    %c0_i32 = arith.constant 0 : i32
    %c0_i32_0 = arith.constant 0 : i32
    %c0_i32_1 = arith.constant 0 : i32
    return %c0_i32, %c0_i32_0 : i32, i32
  }
  func.func @transform_8(%arg0: i32) -> (i32, i32) {
    %c0_i32 = arith.constant 0 : i32
    %c0_i32_0 = arith.constant 0 : i32
    return %arg0, %c0_i32 : i32, i32
  }
  func.func @transform_9(%arg0: i32) -> (i32, i32) {
    %c0_i32 = arith.constant 0 : i32
    %c0_i32_0 = arith.constant 0 : i32
    %c0_i32_1 = arith.constant 0 : i32
    return %c0_i32, %c0_i32_0 : i32, i32
  }
  func.func @transform_10(%arg0: i32) -> (i32, i32) {
    %c0_i32 = arith.constant 0 : i32
    %c0_i32_0 = arith.constant 0 : i32
    return %arg0, %c0_i32 : i32, i32
  }
}

</mosaic_0001>

<bundles_post_ra>
// kernel: tpu_custom_call.1
= control target key start
LH: loop header
LB: loop body
LE: loop exit
PB: predicated region body
PF: predicated region fallthrough
CT: control target
= control target key end

     0   :  { %s2381_s0 = inlined_call_operand.vmem [shape: f32[256,16], index: 0, kind: input, shape index: {}]   ;;  %s2382_s1 = inlined_call_operand.vmem [shape: f32[16,32], index: 1, kind: input, shape index: {}]   ;;  %s2383_s2 = inlined_call_operand.vmem [shape: f32[1,32], index: 2, kind: input, shape index: {}]   ;;  %s2384_s3 = inlined_call_operand.vmem [shape: f32[32,32], index: 3, kind: input, shape index: {}]   ;;  %s2385_s4 = inlined_call_operand.vmem [shape: f32[1,32], index: 4, kind: input, shape index: {}]   ;;  %s2386_s5 = inlined_call_operand.vmem [shape: f32[32,8], index: 5, kind: input, shape index: {}]   ;;  %s2387_s6 = inlined_call_operand.vmem [shape: f32[1,8], index: 6, kind: input, shape index: {}]   ;;  %s2388_s7 = inlined_call_operand.vmem [shape: f32[1,8], index: 7, kind: input, shape index: {}]   ;;  %s2389_s8 = inlined_call_operand.vmem [shape: f32[256,8], index: 8, kind: input, shape index: {}]   ;;  %s2390_s9 = inlined_call_operand.<no memory space> [shape: f32[1,1], index: 9, kind: input, shape index: {}]   ;;  %s2391_s10 = inlined_call_operand.hbm [shape: f32[256,128], index: 10, kind: output, shape index: {}]  }
   0x1   :  { %15 = sst [smem:[#allocation2]] %s2390_s9 }
   0x2   :  { %16 = vsyncpa [#allocation4], 0 }
   0x3   :  { %18 = vsyncpa [#allocation4 + $0x1], 0  ;;  %s1867_s15 = smov 0   ;;  %s1869_s16 = smov 0  }
   0x4   :  { %s1871_s17 = smov 0   ;;  %s1873_s18 = smov 0  }
   0x5 LB: > { %s1888_s9 = sadd.s32 4294967295, %s1803_s18   ;;  %s1416_s19 = sadd.s32 4294967294, %s1803_s18   ;;  %s1803_s18 = sphi %s1873_s18, %s2397_s18   ;;  %s1799_s17 = sphi %s1871_s17, %s2396_s17   ;;  %s1795_s16 = sphi %s1869_s16, %s2395_s16   ;;  %s1791_s15 = sphi %s1867_s15, %s2394_s15  }
   0x6   : > { %s1892_s20 = sadd.s32 1, %s1803_s18   ;;  %s251_s21 = sadd.s32 1, %s1799_s17 }
   0x7   : > { %s248_s22 = ssub.s32 %s1803_s18, %s1892_s20  ;;  %p261_p0 = scmp.ne.s32.totalorder %s1799_s17, %s1795_s16 }
   0x8   : > { %p249_p1 = scmp.eq.s32.totalorder %s248_s22, 0  ;;  %p262_p2 = scmp.eq.s32.totalorder %s1888_s9, 1 }
   0x9   : > { %p267_p3 = scmp.ne.s32.totalorder %s1795_s16, %s1791_s15  ;;  %p268_p4 = scmp.eq.s32.totalorder %s1416_s19, 1 }
   0xa   : > { %s1903_s23 = scalar_select %p249_p1, %s1799_s17, %s251_s21  }
   0xb   : > { %p1905_p5 = por %p262_p2, %p261_p0  ;;  %p1909_p6 = por %p268_p4, %p267_p3 }
   0xc   : > { %p1419_p7 = scmp.ge.s32.totalorder %s1803_s18, 1  ;;  %p328_p8 = scmp.lt.s32.totalorder %s1803_s18, 3 }
   0xe   : > { %p329_p9 = pnand %p1419_p7, %p328_p8 }
   0xf   : > { %s1421_s30 = sshll.u32 (!%p329_p9), %s1888_s9, 4  ;;  %s368_s21 = sand.u32 (!%p329_p9), 1, %s1795_s16  }
  0x10   : > { %332 = sbr.rel (%p329_p9) target bundleno = 810 (0x32a), region = 60  ;;  %p372_p10 = scmp.lt.s32.totalorder (!%p329_p9), %s1421_s30, 31 }
  0x11   : > { %s1420_s22 = sshll.u32 (!%p329_p9), %s368_s21, 7  ;;  %s1806_s13 = smov (!%p329_p9), 8  }
  0x12   : > { %s2114_s26 = scalar_lea.vmem (!%p329_p9), [#allocation3], %s1420_s22  ;;  %s1807_s29 = smov (!%p329_p9), [#allocation3]  }
  0x13   : > { %s1747_s12 = sshll.u32 (!%p329_p9), %s1807_s29, 4  ;;  %s1748_s12 = int_to_ptr.vmem [resolvable:$false] %s1747_s12 }
  0x15   : > { %v401_v0 = vld [vmem:[%s2382_s1 + $0x8] sm:$0xff]  ;;  %v400_v1 = vld [vmem:[%s2382_s1] sm:$0xff]  ;;  %s2399_s30 = smov (!%p372_p10, %s1421_s30), 31  ;;  %vm409_vm0 = vcmask 130048   ;;  %v622_v18 = vld [vmem:[%s2384_s3 + $0x18] sm:$0xff]  ;;  %vm630_vm1 = vcmask 261120  }
  0x16   : > { %1541 = vmatprep.subr.mxu0 %v401_v0  ;;  %1633 = vmatprep.subr.mxu1 %v401_v0  ;;  %s1422_s11 = sshll.u32 %s2399_s30, 3  ;;  %v621_v19 = vld [vmem:[%s2384_s3 + $0x10] sm:$0xff]  ;;  %v620_v20 = vld [vmem:[%s2384_s3 + $0x8] sm:$0xff]  ;;  %v619_v21 = vld [vmem:[%s2384_s3] sm:$0xff]  ;;  %vm1115_vm2 = vcmask 64512   ;;  %vm1294_vm3 = vcmask 130112  }
  0x17   : > { %1542 = vmatpush3.msra.mxu0 %v401_v0  ;;  %1635 = vmatpush3.msra.mxu1 %v401_v0  ;;  %s375_s14 = scalar_lea.vmem %s2381_s0, %s1422_s11  ;;  %v1425_v22 = vld [vmem:[%s2383_s2] ss:$0 sm:$0xff]  ;;  %s1994_s19 = scalar_lea.vmem %s2389_s8, %s1422_s11  ;;  %vm1311_vm4 = vcmask 138368  }
  0x18   : > { %1543 = vmatprep.subr.mxu0 %v400_v1  ;;  %1634 = vmatprep.subr.mxu1 %v400_v1  ;;  %v384_v2 = vld [vmem:[%s375_s14] sm:$0xff]  ;;  %v385_v3 = vld [vmem:[%s375_s14 + $0x8] sm:$0xff]  ;;  %v386_v4 = vld [vmem:[%s375_s14 + $0x10] sm:$0xff]  ;;  %s1342_s30 = sshll.u32 %s2114_s26, 4  ;;  %s2332_s30 = int_to_ptr.vmem [resolvable:$true] %s1342_s30 }
  0x19   : > { %1544 = vmatpush3.msra.mxu0 %v400_v1  ;;  %1636 = vmatpush3.msra.mxu1 %v400_v1  ;;  %v392_v5 = vld [vmem:[%s375_s14 + $0x40] sm:$0xff]  ;;  %v387_v6 = vld [vmem:[%s375_s14 + $0x18] sm:$0xff]  ;;  %v393_v7 = vld [vmem:[%s375_s14 + $0x48] sm:$0xff]  ;;  %s1743_s28 = scalar_lea.vmem %s2332_s30, 2048  ;;  %p1750_p0 = scmp.lt.s32.totalorder %s2332_s30, %s1748_s12 }
  0x1a   : > { %1545 = vmatprep.mubr.msk.f32.mxu0 %vm409_vm0, %v384_v2  ;;  %1557 = vmatprep.mubr.msk.f32.mxu1 %vm409_vm0, %v392_v5  ;;  %v394_v8 = vld [vmem:[%s375_s14 + $0x50] sm:$0xff]  ;;  %v388_v9 = vld [vmem:[%s375_s14 + $0x20] sm:$0xff]  ;;  %v395_v10 = vld [vmem:[%s375_s14 + $0x58] sm:$0xff]  ;;  %p1744_p11 = scmp.ne.s32.totalorder %s2332_s30, %s1743_s28 }
  0x1b   : > { %1546 = vmatmul.mubr.msk.f32.vlgmr.msra.gmra.mxu0 %vm409_vm0, %v385_v3  ;;  %1558 = vmatmul.mubr.msk.f32.vlgmr.msra.gmra.mxu1 %vm409_vm0, %v393_v7  ;;  %v396_v11 = vld [vmem:[%s375_s14 + $0x60] sm:$0xff]  ;;  %v389_v12 = vld [vmem:[%s375_s14 + $0x28] sm:$0xff]  ;;  %v390_v13 = vld [vmem:[%s375_s14 + $0x30] sm:$0xff] }
  0x1c   : > { %1548 = vmatprep.mubr.msk.f32.mxu0 %vm409_vm0, %v386_v4  ;;  %1560 = vmatprep.mubr.msk.f32.mxu1 %vm409_vm0, %v394_v8  ;;  %v397_v14 = vld [vmem:[%s375_s14 + $0x68] sm:$0xff]  ;;  %v398_v15 = vld [vmem:[%s375_s14 + $0x70] sm:$0xff]  ;;  %v391_v16 = vld [vmem:[%s375_s14 + $0x38] sm:$0xff]  ;;  %p1745_p12 = pnand %p1744_p11, %p1905_p5 }
  0x1d   : > { %v399_v17 = vld [vmem:[%s375_s14 + $0x78] sm:$0xff]  ;;  %1569 = vmatprep.subr.mxu1 %v622_v18  ;;  %v842_v8 = vld [vmem:[%s2386_s5 + $0x10] sm:$0xff]  ;;  %s1180_s14 = sld [smem:[#allocation2]] }
  0x1e   : > { %1570 = vmatpush3.msra.mxu1 %v622_v18  ;;  %v843_v7 = vld [vmem:[%s2386_s5 + $0x18] sm:$0xff]  ;;  %p1746_p13 = pneg %p1745_p12 }
  0x1f   : > { %1549 = vmatmul.mubr.msk.f32.gmra.mxu0 %vm409_vm0, %v387_v6  ;;  %1561 = vmatmul.mubr.msk.f32.gmra.mxu1 %vm409_vm0, %v395_v10  ;;  %v840_v10 = vld [vmem:[%s2386_s5] sm:$0xff] }
  0x20   : > { %1551 = vmatprep.mubr.msk.f32.mxu0 %vm409_vm0, %v388_v9  ;;  %1563 = vmatprep.mubr.msk.f32.mxu1 %vm409_vm0, %v396_v11  ;;  %v841_v9 = vld [vmem:[%s2386_s5 + $0x8] sm:$0xff]  ;;  %v1997_v11 = vld [vmem:[%s1994_s19 + $0x10] sm:$0xff] }
  0x21   : > { %1571 = vmatprep.subr.mxu1 %v621_v19  ;;  %1601 = vmatprep.subr.mxu0 %v843_v7 }
  0x22   : > { %1572 = vmatpush3.msra.mxu1 %v621_v19  ;;  %1602 = vmatpush3.msra.mxu0 %v843_v7  ;;  %v2017_v19 = vld [vmem:[%s1994_s19 + $0x28] sm:$0xff] }
  0x23   : > { %1552 = vmatmul.mubr.msk.f32.gmra.mxu0 %vm409_vm0, %v389_v12  ;;  %1564 = vmatmul.mubr.msk.f32.gmra.mxu1 %vm409_vm0, %v397_v14  ;;  %v2000_v12 = vld [vmem:[%s1994_s19] sm:$0xff] }
  0x24   : > { %1554 = vmatprep.mubr.msk.f32.mxu0 %vm409_vm0, %v390_v13  ;;  %1566 = vmatprep.mubr.msk.f32.mxu1 %vm409_vm0, %v398_v15  ;;  %v1101_v13 = vmul.f32 %v1997_v11, %v1997_v11  ;;  %v1099_v14 = vmul.f32 %v2000_v12, %v2000_v12  ;;  %v2007_v15 = vld [vmem:[%s1994_s19 + $0x18] sm:$0xff] }
  0x25   : > { %1573 = vmatprep.subr.mxu1 %v620_v20  ;;  %1603 = vmatprep.subr.mxu0 %v842_v8 }
  0x26   : > { %1574 = vmatpush3.msra.mxu1 %v620_v20  ;;  %1604 = vmatpush3.msra.mxu0 %v842_v8  ;;  %v2020_v20 = vld [vmem:[%s1994_s19 + $0x20] sm:$0xff] }
  0x27   : > { %1555 = vmatmul.mubr.msk.f32.gmra.mxu0 %vm409_vm0, %v391_v16  ;;  %1567 = vmatmul.mubr.msk.f32.gmra.mxu1 %vm409_vm0, %v399_v17  ;;  %v2010_v16 = vld [vmem:[%s1994_s19 + $0x8] sm:$0xff]  ;;  %v1102_v17 = vmul.f32 %v2007_v15, %v2007_v15 }
  0x28   : > { %1575 = vmatprep.subr.mxu1 %v619_v21  ;;  %1605 = vmatprep.subr.mxu0 %v841_v9  ;;  %v1100_v18 = vmul.f32 %v2010_v16, %v2010_v16 }
  0x29   : > { %1576 = vmatpush3.msra.mxu1 %v619_v21  ;;  %1606 = vmatpush3.msra.mxu0 %v841_v9  ;;  %v1122_v21 = vsel %vm1115_vm2, %v1101_v13, 0.0 }
  0x2a   : > { %1607 = vmatprep.subr.mxu0 %v840_v10  ;;  %1123 = vadd.xlane.f32.xlu1 %v1122_v21 }
  0x2b   : > { %1608 = vmatpush3.msra.mxu0 %v840_v10 }
  0xdb   : > { %v1547_v23 = vpop.f32.mrf.mxu0  ;;  %v1559_v26 = vpop.f32.mrf.mxu1 }
  0xdc   : > { %v530_v24 = vadd.f32 %v1547_v23, %v1425_v22  ;;  %v570_v46 = vadd.f32 %v1559_v26, %v1425_v22  ;;  %v1125_v23 = vsel %vm1115_vm2, %v1102_v17, 0.0  ;;  %v1103_v26 = vmul.f32 %v2020_v20, %v2020_v20 }
  0xdd   : > { %v524_v25 = vpop.f32.mrf.mxu0  ;;  %v564_v29 = vpop.f32.mrf.mxu1  ;;  %1126 = vadd.xlane.f32.xlu1 %v1125_v23 }
  0xde   : > { %v525_v27 = vadd.f32 %v1425_v22, %v524_v25  ;;  %v565_v40 = vadd.f32 %v1425_v22, %v564_v29  ;;  %v1104_v25 = vmul.f32 %v2017_v19, %v2017_v19 }
  0xdf   : > { %v1550_v28 = vpop.f32.mrf.mxu0  ;;  %v1562_v32 = vpop.f32.mrf.mxu1 }
  0xe0   : > { %1679 = vtanh.f32 %v525_v27  ;;  %v540_v30 = vadd.f32 %v1550_v28, %v1425_v22  ;;  %v580_v51 = vadd.f32 %v1562_v32, %v1425_v22  ;;  %v2031_v27 = vld [vmem:[%s1994_s19 + $0x38] sm:$0xff]  ;;  %v2034_v28 = vld [vmem:[%s1994_s19 + $0x30] sm:$0xff]  ;;  %v1131_v29 = vsel %vm1115_vm2, %v1104_v25, 0.0 }
  0xe1   : > { %1681 = vtanh.f32 %v530_v24  ;;  %v534_v31 = vpop.f32.mrf.mxu0  ;;  %v574_v35 = vpop.f32.mrf.mxu1  ;;  %v1119_v24 = vsel %vm1115_vm2, %v1100_v18, 0.0  ;;  %v1105_v32 = vmul.f32 %v2034_v28, %v2034_v28  ;;  %1132 = vadd.xlane.f32.xlu1 %v1131_v29 }
  0xe2   : > { %v535_v33 = vadd.f32 %v1425_v22, %v534_v31  ;;  %v575_v47 = vadd.f32 %v1425_v22, %v574_v35  ;;  %v1106_v31 = vmul.f32 %v2031_v27, %v2031_v27 }
  0xe3   : > { %v1553_v34 = vpop.f32.mrf.mxu0  ;;  %v1565_v38 = vpop.f32.mrf.mxu1 }
  0xe4   : > { %1683 = vtanh.f32 %v535_v33  ;;  %v550_v36 = vadd.f32 %v1553_v34, %v1425_v22  ;;  %v590_v56 = vadd.f32 %v1565_v38, %v1425_v22  ;;  %v2043_v33 = vld [vmem:[%s1994_s19 + $0x48] sm:$0xff]  ;;  %v2046_v34 = vld [vmem:[%s1994_s19 + $0x40] sm:$0xff]  ;;  %v1137_v35 = vsel %vm1115_vm2, %v1106_v31, 0.0 }
  0xe5   : > { %1685 = vtanh.f32 %v540_v30  ;;  %v544_v37 = vpop.f32.mrf.mxu0  ;;  %v584_v44 = vpop.f32.mrf.mxu1  ;;  %v1128_v30 = vsel %vm1115_vm2, %v1103_v26, 0.0  ;;  %v1107_v38 = vmul.f32 %v2046_v34, %v2046_v34  ;;  %1138 = vadd.xlane.f32.xlu1 %v1137_v35 }
  0xe6   : > { %v545_v39 = vadd.f32 %v1425_v22, %v544_v37  ;;  %1687 = vtanh.f32 %v550_v36  ;;  %v585_v52 = vadd.f32 %v1425_v22, %v584_v44  ;;  %v1134_v36 = vsel %vm1115_vm2, %v1105_v32, 0.0 }
  0xe7   : > { %v1556_v41 = vpop.f32.mrf.mxu0  ;;  %v1568_v49 = vpop.f32.mrf.mxu1  ;;  %v1108_v37 = vmul.f32 %v2043_v33, %v2043_v33 }
  0xe8   : > { %1689 = vtanh.f32 %v545_v39  ;;  %v560_v42 = vadd.f32 %v1556_v41, %v1425_v22  ;;  %v600_v61 = vadd.f32 %v1568_v49, %v1425_v22  ;;  %v2055_v39 = vld [vmem:[%s1994_s19 + $0x58] sm:$0xff] }
  0xe9   : > { %v554_v43 = vpop.f32.mrf.mxu0  ;;  %1691 = vtanh.f32 %v565_v40  ;;  %v594_v54 = vpop.f32.mrf.mxu1  ;;  %v2058_v40 = vld [vmem:[%s1994_s19 + $0x50] sm:$0xff]  ;;  %v1143_v41 = vsel %vm1115_vm2, %v1108_v37, 0.0 }
  0xea   : > { %v555_v45 = vadd.f32 %v1425_v22, %v554_v43  ;;  %1693 = vtanh.f32 %v560_v42  ;;  %v595_v58 = vadd.f32 %v1425_v22, %v594_v54  ;;  %v1116_v22 = vsel %vm1115_vm2, %v1099_v14, 0.0  ;;  %1144 = vadd.xlane.f32.xlu1 %v1143_v41 }
  0xeb   : > { %1117 = vadd.xlane.f32.xlu0 %v1116_v22  ;;  %v1140_v42 = vsel %vm1115_vm2, %v1107_v38, 0.0  ;;  %v1110_v43 = vmul.f32 %v2055_v39, %v2055_v39  ;;  %v1109_v44 = vmul.f32 %v2058_v40, %v2058_v40 }
  0xec   : > { %1695 = vtanh.f32 %v555_v45  ;;  %v2067_v45 = vld [vmem:[%s1994_s19 + $0x68] sm:$0xff] }
  0xed   : > { %v1680_v48 = vpop.eup %1679  ;;  %1697 = vtanh.f32 %v570_v46  ;;  %v2070_v46 = vld [vmem:[%s1994_s19 + $0x60] sm:$0xff]  ;;  %v1112_v49 = vmul.f32 %v2067_v45, %v2067_v45 }
  0xee   : > { %v1682_v50 = vpop.eup %1681  ;;  %1577 = vmatprep.mubr.msk.f32.mxu1 %vm630_vm1, %v1680_v48  ;;  %1699 = vtanh.f32 %v575_v47  ;;  %v1149_v47 = vsel %vm1115_vm2, %v1110_v43, 0.0  ;;  %v1146_v48 = vsel %vm1115_vm2, %v1109_v44, 0.0 }
  0xef   : > { %1578 = vmatmul.mubr.msk.f32.vlgmr.msra.gmra.mxu1 %vm630_vm1, %v1682_v50  ;;  %1701 = vtanh.f32 %v580_v51  ;;  %1120 = vadd.xlane.f32.xlu0 %v1119_v24  ;;  %v1111_v50 = vmul.f32 %v2070_v46, %v2070_v46  ;;  %v2079_v51 = vld [vmem:[%s1994_s19 + $0x78] sm:$0xff] }
  0xf0   : > { %1703 = vtanh.f32 %v585_v52  ;;  %v2082_v52 = vld [vmem:[%s1994_s19 + $0x70] sm:$0xff]  ;;  %1150 = vadd.xlane.f32.xlu1 %v1149_v47  ;;  %s1482_s19 = sshll.u32 %s1888_s9, 11  ;;  %s2340_s9 = scalar_lea.sflag [#allocation4], %s368_s21 }
  0xf1   : > { %v1684_v53 = vpop.eup %1683  ;;  %1705 = vtanh.f32 %v590_v56  ;;  %v1152_v54 = vsel %vm1115_vm2, %v1111_v50, 0.0  ;;  %v1113_v56 = vmul.f32 %v2082_v52, %v2082_v52  ;;  %s2327_s27 = scalar_lea.hbm %s2391_s10, %s1482_s19 }
  0xf2   : > { %v1686_v55 = vpop.eup %1685  ;;  %1580 = vmatprep.mubr.msk.f32.mxu1 %vm630_vm1, %v1684_v53  ;;  %1707 = vtanh.f32 %v595_v58  ;;  %v1155_v53 = vsel %vm1115_vm2, %v1112_v49, 0.0 }
  0xf3   : > { %1581 = vmatmul.mubr.msk.f32.gmra.mxu1 %vm630_vm1, %v1686_v55  ;;  %v1688_v57 = vpop.eup %1687  ;;  %1709 = vtanh.f32 %v600_v61  ;;  %1129 = vadd.xlane.f32.xlu0 %v1128_v30  ;;  %v1114_v55 = vmul.f32 %v2079_v51, %v2079_v51  ;;  %v1158_v58 = vsel %vm1115_vm2, %v1113_v56, 0.0 }
  0xf4   : > { %1156 = vadd.xlane.f32.xlu1 %v1155_v53 }
  0xf5   : > { %v1690_v59 = vpop.eup %1689 }
  0xf6   : > { %1583 = vmatprep.mubr.msk.f32.mxu1 %vm630_vm1, %v1690_v59  ;;  %v1692_v60 = vpop.eup %1691  ;;  %v1442_v59 = vld [vmem:[%s2385_s4] ss:$0 sm:$0xff] }
  0xf7   : > { %1584 = vmatmul.mubr.msk.f32.gmra.mxu1 %vm630_vm1, %v1688_v57  ;;  %v1694_v62 = vpop.eup %1693  ;;  %1135 = vadd.xlane.f32.xlu0 %v1134_v36  ;;  %v1161_v57 = vsel %vm1115_vm2, %v1114_v55, 0.0 }
  0xf8   : > { %1162 = vadd.xlane.f32.xlu1 %v1161_v57 }
  0xf9   : > { %v1696_v63 = vpop.eup %1695 }
  0xfa   : > { %1586 = vmatprep.mubr.msk.f32.mxu1 %vm630_vm1, %v1696_v63  ;;  %v1698_v0 = vpop.eup %1697 }
  0xfb   : > { %1587 = vmatmul.mubr.msk.f32.gmra.mxu1 %vm630_vm1, %v1694_v62  ;;  %v1700_v1 = vpop.eup %1699  ;;  %1141 = vadd.xlane.f32.xlu0 %v1140_v42 }
  0xfc   : > { %1589 = vmatprep.mubr.msk.f32.mxu1 %vm630_vm1, %v1692_v60  ;;  %v1702_v2 = vpop.eup %1701 }
  0xfd   : > { %v1704_v3 = vpop.eup %1703 }
  0xfe   : > { %v1706_v4 = vpop.eup %1705 }
  0xff   : > { %1590 = vmatmul.mubr.msk.f32.gmra.mxu1 %vm630_vm1, %v1698_v0  ;;  %v1708_v5 = vpop.eup %1707  ;;  %1147 = vadd.xlane.f32.xlu0 %v1146_v48 }
 0x100   : > { %1592 = vmatprep.mubr.msk.f32.mxu1 %vm630_vm1, %v1700_v1  ;;  %v1710_v6 = vpop.eup %1709 }
 0x103   : > { %1593 = vmatmul.mubr.msk.f32.gmra.mxu1 %vm630_vm1, %v1702_v2  ;;  %1153 = vadd.xlane.f32.xlu0 %v1152_v54 }
 0x104   : > { %1595 = vmatprep.mubr.msk.f32.mxu1 %vm630_vm1, %v1704_v3 }
 0x107   : > { %1596 = vmatmul.mubr.msk.f32.gmra.mxu1 %vm630_vm1, %v1706_v4  ;;  %1159 = vadd.xlane.f32.xlu0 %v1158_v58 }
 0x108   : > { %1598 = vmatprep.mubr.msk.f32.mxu1 %vm630_vm1, %v1708_v5 }
 0x10b   : > { %1599 = vmatmul.mubr.msk.f32.gmra.mxu1 %vm630_vm1, %v1710_v6 }
 0x1af   : > { %v1579_v60 = vpop.f32.mrf.mxu1 }
 0x1b0   : > { %v751_v61 = vadd.f32 %v1579_v60, %v1442_v59  ;;  %v1805_v60 = vmov 0.0  }
 0x1b1   : > { %v745_v62 = vpop.f32.mrf.mxu1  ;;  %1199 = vst [vmem:[%s2114_s26 + $0x8] sm:$0xff] %v1805_v60  ;;  %1198 = vst [vmem:[%s2114_s26] sm:$0xff] %v1805_v60 }
 0x1b2   : > { %v746_v63 = vadd.f32 %v1442_v59, %v745_v62  ;;  %1200 = vst [vmem:[%s2114_s26 + $0x10] sm:$0xff] %v1805_v60  ;;  %1201 = vst [vmem:[%s2114_s26 + $0x18] sm:$0xff] %v1805_v60  ;;  %v2140_v62 = vld [vmem:[%s2387_s6] ss:$0 sm:$0xff] }
 0x1b3   : > { %v1582_v0 = vpop.f32.mrf.mxu1  ;;  %1202 = vst [vmem:[%s2114_s26 + $0x20] sm:$0xff] %v1805_v60  ;;  %1203 = vst [vmem:[%s2114_s26 + $0x28] sm:$0xff] %v1805_v60 }
 0x1b4   : > { %1711 = vtanh.f32 %v746_v63  ;;  %v761_v1 = vadd.f32 %v1582_v0, %v1442_v59  ;;  %1204 = vst [vmem:[%s2114_s26 + $0x30] sm:$0xff] %v1805_v60  ;;  %1205 = vst [vmem:[%s2114_s26 + $0x38] sm:$0xff] %v1805_v60 }
 0x1b5   : > { %1713 = vtanh.f32 %v751_v61  ;;  %v755_v2 = vpop.f32.mrf.mxu1  ;;  %1206 = vst [vmem:[%s2114_s26 + $0x40] sm:$0xff] %v1805_v60  ;;  %1207 = vst [vmem:[%s2114_s26 + $0x48] sm:$0xff] %v1805_v60  ;;  %v2135_v61 = vld [vmem:[%s2388_s7] ss:$0 sm:$0xff] }
 0x1b6   : > { %v756_v3 = vadd.f32 %v1442_v59, %v755_v2  ;;  %1208 = vst [vmem:[%s2114_s26 + $0x50] sm:$0xff] %v1805_v60  ;;  %1209 = vst [vmem:[%s2114_s26 + $0x58] sm:$0xff] %v1805_v60  ;;  %v1068_v63 = vmul.f32 %v2135_v61, %v2010_v16 }
 0x1b7   : > { %v1585_v4 = vpop.f32.mrf.mxu1  ;;  %1210 = vst [vmem:[%s2114_s26 + $0x60] sm:$0xff] %v1805_v60  ;;  %1211 = vst [vmem:[%s2114_s26 + $0x68] sm:$0xff] %v1805_v60 }
 0x1b8   : > { %1715 = vtanh.f32 %v756_v3  ;;  %v771_v5 = vadd.f32 %v1585_v4, %v1442_v59  ;;  %1212 = vst [vmem:[%s2114_s26 + $0x70] sm:$0xff] %v1805_v60  ;;  %1213 = vst [vmem:[%s2114_s26 + $0x78] sm:$0xff] %v1805_v60 }
 0x1b9   : > { %1717 = vtanh.f32 %v761_v1  ;;  %v765_v6 = vpop.f32.mrf.mxu1  ;;  %v1067_v1 = vmul.f32 %v2135_v61, %v2000_v12 }
 0x1ba   : > { %v766_v7 = vadd.f32 %v1442_v59, %v765_v6  ;;  %v1070_v6 = vmul.f32 %v2135_v61, %v2007_v15 }
 0x1bb   : > { %v1588_v8 = vpop.f32.mrf.mxu1 }
 0x1bc   : > { %1719 = vtanh.f32 %v766_v7  ;;  %v781_v9 = vadd.f32 %v1588_v8, %v1442_v59 }
 0x1bd   : > { %1721 = vtanh.f32 %v771_v5  ;;  %v775_v10 = vpop.f32.mrf.mxu1 }
 0x1be   : > { %v776_v13 = vadd.f32 %v1442_v59, %v775_v10 }
 0x1bf   : > { %v1591_v14 = vpop.f32.mrf.mxu1 }
 0x1c0   : > { %1723 = vtanh.f32 %v776_v13  ;;  %v791_v18 = vadd.f32 %v1591_v14, %v1442_v59 }
 0x1c1   : > { %v1712_v17 = vpop.eup %1711  ;;  %1725 = vtanh.f32 %v781_v9  ;;  %v785_v21 = vpop.f32.mrf.mxu1  ;;  %v1069_v9 = vmul.f32 %v2135_v61, %v1997_v11 }
 0x1c2   : > { %v1714_v22 = vpop.eup %1713  ;;  %v786_v23 = vadd.f32 %v1442_v59, %v785_v21  ;;  %1609 = vmatprep.mubr.msk.f32.mxu0 %vm630_vm1, %v1712_v17  ;;  %v1071_v17 = vmul.f32 %v2135_v61, %v2020_v20  ;;  %v1072_v21 = vmul.f32 %v2135_v61, %v2017_v19  ;;  %v1073_v20 = vmul.f32 %v2135_v61, %v2034_v28 }
 0x1c3   : > { %v1594_v24 = vpop.f32.mrf.mxu1  ;;  %1610 = vmatmul.mubr.msk.f32.vlgmr.msra.gmra.mxu0 %vm630_vm1, %v1714_v22  ;;  %v1074_v19 = vmul.f32 %v2135_v61, %v2031_v27  ;;  %v1075_v28 = vmul.f32 %v2135_v61, %v2046_v34  ;;  %v1077_v34 = vmul.f32 %v2135_v61, %v2058_v40  ;;  %v1079_v40 = vmul.f32 %v2135_v61, %v2070_v46 }
 0x1c4   : > { %1727 = vtanh.f32 %v786_v23  ;;  %v801_v26 = vadd.f32 %v1594_v24, %v1442_v59  ;;  %v1081_v46 = vmul.f32 %v2135_v61, %v2082_v52  ;;  %v1124_v52 = vpop.xlane.xlu1 %1123 }
 0x1c5   : > { %v1716_v25 = vpop.eup %1715  ;;  %1729 = vtanh.f32 %v791_v18  ;;  %v795_v29 = vpop.f32.mrf.mxu1 }
 0x1c6   : > { %v1718_v30 = vpop.eup %1717  ;;  %v796_v31 = vadd.f32 %v1442_v59, %v795_v29  ;;  %1612 = vmatprep.mubr.msk.f32.mxu0 %vm630_vm1, %v1716_v25 }
 0x1c7   : > { %v1597_v32 = vpop.f32.mrf.mxu1  ;;  %1613 = vmatmul.mubr.msk.f32.gmra.mxu0 %vm630_vm1, %v1718_v30 }
 0x1c8   : > { %1731 = vtanh.f32 %v796_v31  ;;  %v811_v36 = vadd.f32 %v1597_v32, %v1442_v59 }
 0x1c9   : > { %v1720_v35 = vpop.eup %1719  ;;  %1733 = vtanh.f32 %v801_v26  ;;  %v805_v37 = vpop.f32.mrf.mxu1 }
 0x1ca   : > { %v1722_v38 = vpop.eup %1721  ;;  %v806_v41 = vadd.f32 %v1442_v59, %v805_v37  ;;  %1615 = vmatprep.mubr.msk.f32.mxu0 %vm630_vm1, %v1720_v35  ;;  %v1076_v37 = vmul.f32 %v2135_v61, %v2043_v33 }
 0x1cb   : > { %v1600_v42 = vpop.f32.mrf.mxu1  ;;  %1616 = vmatmul.mubr.msk.f32.gmra.mxu0 %vm630_vm1, %v1722_v38 }
 0x1cc   : > { %1735 = vtanh.f32 %v806_v41  ;;  %v821_v44 = vadd.f32 %v1600_v42, %v1442_v59 }
 0x1cd   : > { %v1724_v43 = vpop.eup %1723  ;;  %1737 = vtanh.f32 %v811_v36  ;;  %v815_v47 = vpop.f32.mrf.mxu1 }
 0x1ce   : > { %v1726_v48 = vpop.eup %1725  ;;  %v816_v49 = vadd.f32 %v1442_v59, %v815_v47  ;;  %1618 = vmatprep.mubr.msk.f32.mxu0 %vm630_vm1, %v1724_v43  ;;  %v1078_v47 = vmul.f32 %v2135_v61, %v2055_v39 }
 0x1cf   : > { %1619 = vmatmul.mubr.msk.f32.gmra.mxu0 %vm630_vm1, %v1726_v48 }
 0x1d0   : > { %1739 = vtanh.f32 %v816_v49 }
 0x1d1   : > { %v1728_v50 = vpop.eup %1727  ;;  %1741 = vtanh.f32 %v821_v44 }
 0x1d2   : > { %v1730_v53 = vpop.eup %1729  ;;  %1621 = vmatprep.mubr.msk.f32.mxu0 %vm630_vm1, %v1728_v50 }
 0x1d3   : > { %1622 = vmatmul.mubr.msk.f32.gmra.mxu0 %vm630_vm1, %v1730_v53 }
 0x1d5   : > { %v1732_v54 = vpop.eup %1731 }
 0x1d6   : > { %v1734_v55 = vpop.eup %1733  ;;  %1624 = vmatprep.mubr.msk.f32.mxu0 %vm630_vm1, %v1732_v54 }
 0x1d7   : > { %1625 = vmatmul.mubr.msk.f32.gmra.mxu0 %vm630_vm1, %v1734_v55  ;;  %v1080_v55 = vmul.f32 %v2135_v61, %v2067_v45 }
 0x1d9   : > { %v1736_v56 = vpop.eup %1735 }
 0x1da   : > { %v1738_v57 = vpop.eup %1737  ;;  %1627 = vmatprep.mubr.msk.f32.mxu0 %vm630_vm1, %v1736_v56 }
 0x1db   : > { %1628 = vmatmul.mubr.msk.f32.gmra.mxu0 %vm630_vm1, %v1738_v57 }
 0x1dd   : > { %v1740_v58 = vpop.eup %1739 }
 0x1de   : > { %v1742_v59 = vpop.eup %1741  ;;  %1630 = vmatprep.mubr.msk.f32.mxu0 %vm630_vm1, %v1740_v58 }
 0x1df   : > { %1631 = vmatmul.mubr.msk.f32.gmra.mxu0 %vm630_vm1, %v1742_v59 }
 0x283   : > { %v1611_v0 = vpop.f32.mrf.mxu0 }
 0x284   : > { %v971_v2 = vadd.f32 %v1611_v0, %v2140_v62 }
 0x285   : > { %v965_v3 = vpop.f32.mrf.mxu0 }
 0x286   : > { %v1084_v4 = vadd.f32 %v1068_v63, %v971_v2  ;;  %v966_v5 = vadd.f32 %v2140_v62, %v965_v3  ;;  %1215 = vst.msk [vmem:[%s2114_s26 + $0x8] sm:$0xff] %vm1115_vm2, %v971_v2  ;;  %v1082_v63 = vmul.f32 %v2135_v61, %v2079_v51  ;;  %v1118_v3 = vpop.xlane.xlu0 %1117 }
 0x287   : > { %v1614_v7 = vpop.f32.mrf.mxu0 }
 0x288   : > { %v1083_v8 = vadd.f32 %v1067_v1, %v966_v5  ;;  %v981_v16 = vadd.f32 %v1614_v7, %v2140_v62  ;;  %1248 = vrot.lane.b32.xlu1 %v1084_v4, %s1806_s13  ;;  %1214 = vst.msk [vmem:[%s2114_s26] sm:$0xff] %vm1115_vm2, %v966_v5  ;;  %v1127_v4 = vpop.xlane.xlu1 %1126 }
 0x289   : > { %v975_v12 = vpop.f32.mrf.mxu0 }
 0x28a   : > { %v1086_v10 = vadd.f32 %v1070_v6, %v981_v16  ;;  %v976_v15 = vadd.f32 %v2140_v62, %v975_v12  ;;  %1246 = vrot.lane.b32.xlu0 %v1083_v8, %s1806_s13  ;;  %1217 = vst.msk [vmem:[%s2114_s26 + $0x18] sm:$0xff] %vm1115_vm2, %v981_v16  ;;  %v1121_v51 = vpop.xlane.xlu0 %1120 }
 0x28b   : > { %v1617_v13 = vpop.f32.mrf.mxu0 }
 0x28c   : > { %v991_v14 = vadd.f32 %v1617_v13, %v2140_v62  ;;  %1252 = vrot.lane.b32.xlu1 %v1086_v10, %s1806_s13  ;;  %1216 = vst.msk [vmem:[%s2114_s26 + $0x10] sm:$0xff] %vm1115_vm2, %v976_v15  ;;  %v1085_v11 = vadd.f32 %v1069_v9, %v976_v15  ;;  %v1133_v61 = vpop.xlane.xlu1 %1132  ;;  %v1165_v13 = vmul.f32 -0.5, %v1121_v51 }
 0x28d   : > { %v985_v18 = vpop.f32.mrf.mxu0 }
 0x28e   : > { %v986_v22 = vadd.f32 %v2140_v62, %v985_v18  ;;  %1219 = vst.msk [vmem:[%s2114_s26 + $0x28] sm:$0xff] %vm1115_vm2, %v991_v14  ;;  %v1088_v29 = vadd.f32 %v1072_v21, %v991_v14  ;;  %v2244_v18 = vstv %s1180_s14  ;;  %s1749_s14 = scalar_lea.vmem %s1748_s12, 4096 }
 0x28f   : > { %v1620_v23 = vpop.f32.mrf.mxu0  ;;  %v1183_v21 = vadd.f32 %v2244_v18, %v1165_v13  ;;  %p1751_p1 = scmp.lt.s32.totalorder %s1749_s14, %s1743_s28 }
 0x290   : > { %v1087_v24 = vadd.f32 %v1071_v17, %v986_v22  ;;  %v1001_v25 = vadd.f32 %v1620_v23, %v2140_v62  ;;  %1250 = vrot.lane.b32.xlu1 %v1085_v11, %s1806_s13  ;;  %1218 = vst.msk [vmem:[%s2114_s26 + $0x20] sm:$0xff] %vm1115_vm2, %v986_v22  ;;  %v1139_v5 = vpop.xlane.xlu1 %1138  ;;  %v1164_v17 = vmul.f32 -0.5, %v1118_v3  ;;  %v1167_v11 = vmul.f32 -0.5, %v1127_v4 }
 0x291   : > { %v995_v26 = vpop.f32.mrf.mxu0  ;;  %p1752_p2 = por %p1751_p1, %p1750_p0 }
 0x292   : > { %v996_v30 = vadd.f32 %v2140_v62, %v995_v26  ;;  %1254 = vrot.lane.b32.xlu0 %v1087_v24, %s1806_s13  ;;  %1221 = vst.msk [vmem:[%s2114_s26 + $0x38] sm:$0xff] %vm1115_vm2, %v1001_v25  ;;  %v1090_v27 = vadd.f32 %v1074_v19, %v1001_v25  ;;  %v1182_v23 = vadd.f32 %v2244_v18, %v1164_v17  ;;  %v1166_v25 = vmul.f32 -0.5, %v1124_v52 }
 0x293   : > { %v1623_v31 = vpop.f32.mrf.mxu0  ;;  %p1753_p3 = pnand %p1752_p2, %p1746_p13 }
 0x294   : > { %v1089_v32 = vadd.f32 %v1073_v20, %v996_v30  ;;  %v1011_v35 = vadd.f32 %v1623_v31, %v2140_v62  ;;  %1256 = vrot.lane.b32.xlu1 %v1088_v29, %s1806_s13  ;;  %1220 = vst.msk [vmem:[%s2114_s26 + $0x30] sm:$0xff] %vm1115_vm2, %v996_v30  ;;  %v1145_v7 = vpop.xlane.xlu1 %1144  ;;  %v1185_v20 = vadd.f32 %v2244_v18, %v1167_v11  ;;  %v1169_v30 = vmul.f32 -0.5, %v1133_v61 }
 0x295   : > { %v1005_v36 = vpop.f32.mrf.mxu0  ;;  %v1184_v19 = vadd.f32 %v2244_v18, %v1166_v25 }
 0x296   : > { %v1006_v38 = vadd.f32 %v2140_v62, %v1005_v36  ;;  %1258 = vrot.lane.b32.xlu0 %v1089_v32, %s1806_s13  ;;  %1223 = vst.msk [vmem:[%s2114_s26 + $0x48] sm:$0xff] %vm1115_vm2, %v1011_v35  ;;  %v1092_v33 = vadd.f32 %v1076_v37, %v1011_v35  ;;  %v1187_v36 = vadd.f32 %v2244_v18, %v1169_v30 }
 0x297   : > { %v1626_v41 = vpop.f32.mrf.mxu0 }
 0x298   : > { %v1091_v42 = vadd.f32 %v1075_v28, %v1006_v38  ;;  %v1021_v43 = vadd.f32 %v1626_v41, %v2140_v62  ;;  %1260 = vrot.lane.b32.xlu1 %v1090_v27, %s1806_s13  ;;  %1222 = vst.msk [vmem:[%s2114_s26 + $0x40] sm:$0xff] %vm1115_vm2, %v1006_v38  ;;  %v1151_v16 = vpop.xlane.xlu1 %1150  ;;  %v1171_v27 = vmul.f32 -0.5, %v1139_v5 }
 0x299   : > { %v1015_v44 = vpop.f32.mrf.mxu0 }
 0x29a   : > { %v1016_v48 = vadd.f32 %v2140_v62, %v1015_v44  ;;  %1262 = vrot.lane.b32.xlu0 %v1091_v42, %s1806_s13  ;;  %1225 = vst.msk [vmem:[%s2114_s26 + $0x58] sm:$0xff] %vm1115_vm2, %v1021_v43  ;;  %v1094_v39 = vadd.f32 %v1078_v47, %v1021_v43  ;;  %v1189_v43 = vadd.f32 %v2244_v18, %v1171_v27 }
 0x29b   : > { %v1629_v49 = vpop.f32.mrf.mxu0 }
 0x29c   : > { %v1093_v50 = vadd.f32 %v1077_v34, %v1016_v48  ;;  %v1031_v53 = vadd.f32 %v1629_v49, %v2140_v62  ;;  %1264 = vrot.lane.b32.xlu1 %v1092_v33, %s1806_s13  ;;  %1224 = vst.msk [vmem:[%s2114_s26 + $0x50] sm:$0xff] %vm1115_vm2, %v1016_v48  ;;  %v2238_v9 = vpop.xlane.xlu1 %1156  ;;  %v1173_v34 = vmul.f32 -0.5, %v1145_v7 }
 0x29d   : > { %v1025_v54 = vpop.f32.mrf.mxu0 }
 0x29e   : > { %v1026_v56 = vadd.f32 %v2140_v62, %v1025_v54  ;;  %1266 = vrot.lane.b32.xlu0 %v1093_v50, %s1806_s13  ;;  %1227 = vst.msk [vmem:[%s2114_s26 + $0x68] sm:$0xff] %vm1115_vm2, %v1031_v53  ;;  %v1096_v45 = vadd.f32 %v1080_v55, %v1031_v53  ;;  %v1191_v49 = vadd.f32 %v2244_v18, %v1173_v34  ;;  %v1175_v50 = vmul.f32 -0.5, %v1151_v16 }
 0x29f   : > { %v1632_v57 = vpop.f32.mrf.mxu0 }
 0x2a0   : > { %v1095_v58 = vadd.f32 %v1079_v40, %v1026_v56  ;;  %v1041_v59 = vadd.f32 %v1632_v57, %v2140_v62  ;;  %1268 = vrot.lane.b32.xlu1 %v1094_v39, %s1806_s13  ;;  %1226 = vst.msk [vmem:[%s2114_s26 + $0x60] sm:$0xff] %vm1115_vm2, %v1026_v56  ;;  %v2240_v15 = vpop.xlane.xlu1 %1162  ;;  %v1193_v55 = vadd.f32 %v2244_v18, %v1175_v50  ;;  %v1177_v56 = vmul.f32 -0.5, %v2238_v9 }
 0x2a1   : > { %v1035_v60 = vpop.f32.mrf.mxu0 }
 0x2a2   : > { %v1036_v0 = vadd.f32 %v2140_v62, %v1035_v60  ;;  %1270 = vrot.lane.b32.xlu0 %v1095_v58, %s1806_s13  ;;  %1229 = vst.msk [vmem:[%s2114_s26 + $0x78] sm:$0xff] %vm1115_vm2, %v1041_v59  ;;  %v1098_v2 = vadd.f32 %v1082_v63, %v1041_v59  ;;  %v1130_v62 = vpop.xlane.xlu0 %1129  ;;  %v1195_v60 = vadd.f32 %v2244_v18, %v1177_v56 }
 0x2a3   : > { %v1168_v29 = vmul.f32 -0.5, %v1130_v62 }
 0x2a4   : > { %v1097_v1 = vadd.f32 %v1081_v46, %v1036_v0  ;;  %1272 = vrot.lane.b32.xlu1 %v1096_v45, %s1806_s13  ;;  %1228 = vst.msk [vmem:[%s2114_s26 + $0x70] sm:$0xff] %vm1115_vm2, %v1036_v0  ;;  %v1179_v45 = vmul.f32 -0.5, %v2240_v15 }
 0x2a5   : > { %v1186_v32 = vadd.f32 %v2244_v18, %v1168_v29 }
 0x2a6   : > { %1274 = vrot.lane.b32.xlu0 %v1097_v1, %s1806_s13  ;;  %v1136_v6 = vpop.xlane.xlu0 %1135 }
 0x2a7   : > { %v1170_v35 = vmul.f32 -0.5, %v1136_v6 }
 0x2a8   : > { %1276 = vrot.lane.b32.xlu1 %v1098_v2, %s1806_s13  ;;  %v1197_v2 = vadd.f32 %v2244_v18, %v1179_v45 }
 0x2a9   : > { %v1188_v38 = vadd.f32 %v2244_v18, %v1170_v35 }
 0x2aa   : > { %v1142_v8 = vpop.xlane.xlu0 %1141 }
 0x2ab   : > { %v1172_v41 = vmul.f32 -0.5, %v1142_v8 }
 0x2ad   : > { %v1190_v33 = vadd.f32 %v2244_v18, %v1172_v41 }
 0x2ae   : > { %v1148_v12 = vpop.xlane.xlu0 %1147 }
 0x2af   : > { %v1174_v47 = vmul.f32 -0.5, %v1148_v12 }
 0x2b1   : > { %v1192_v40 = vadd.f32 %v2244_v18, %v1174_v47 }
 0x2b2   : > { %v1154_v10 = vpop.xlane.xlu0 %1153 }
 0x2b3   : > { %v1176_v54 = vmul.f32 -0.5, %v1154_v10 }
 0x2b5   : > { %v1194_v58 = vadd.f32 %v2244_v18, %v1176_v54 }
 0x2b6   : > { %v2242_v14 = vpop.xlane.xlu0 %1159 }
 0x2b7   : > { %v1178_v59 = vmul.f32 -0.5, %v2242_v14 }
 0x2b9   : > { %v1196_v0 = vadd.f32 %v2244_v18, %v1178_v59 }
 0x2fa   : > { %v1249_v22 = vpop.permute.xlu1 %1248 }
 0x2fb   : > { %1296 = vst.msk [vmem:[%s2114_s26 + $0x8] sm:$0xff] %vm1294_vm3, %v1249_v22 }
 0x2fc   : > { %1313 = vst.msk [vmem:[%s2114_s26 + $0x8] sm:$0xff] %vm1311_vm4, %v1183_v21  ;;  %v1247_v24 = vpop.permute.xlu0 %1246 }
 0x2fd   : > { %1295 = vst.msk [vmem:[%s2114_s26] sm:$0xff] %vm1294_vm3, %v1247_v24 }
 0x2fe   : > { %1312 = vst.msk [vmem:[%s2114_s26] sm:$0xff] %vm1311_vm4, %v1182_v23  ;;  %v1253_v26 = vpop.permute.xlu1 %1252 }
 0x2ff   : > { %1298 = vst.msk [vmem:[%s2114_s26 + $0x18] sm:$0xff] %vm1294_vm3, %v1253_v26 }
 0x300   : > { %1315 = vst.msk [vmem:[%s2114_s26 + $0x18] sm:$0xff] %vm1311_vm4, %v1185_v20 }
 0x302   : > { %v1251_v31 = vpop.permute.xlu1 %1250 }
 0x303   : > { %1297 = vst.msk [vmem:[%s2114_s26 + $0x10] sm:$0xff] %vm1294_vm3, %v1251_v31 }
 0x304   : > { %1314 = vst.msk [vmem:[%s2114_s26 + $0x10] sm:$0xff] %vm1311_vm4, %v1184_v19  ;;  %v1255_v28 = vpop.permute.xlu0 %1254 }
 0x305   : > { %1299 = vst.msk [vmem:[%s2114_s26 + $0x20] sm:$0xff] %vm1294_vm3, %v1255_v28 }
 0x306   : > { %1316 = vst.msk [vmem:[%s2114_s26 + $0x20] sm:$0xff] %vm1311_vm4, %v1186_v32  ;;  %v1257_v37 = vpop.permute.xlu1 %1256 }
 0x307   : > { %1300 = vst.msk [vmem:[%s2114_s26 + $0x28] sm:$0xff] %vm1294_vm3, %v1257_v37 }
 0x308   : > { %1317 = vst.msk [vmem:[%s2114_s26 + $0x28] sm:$0xff] %vm1311_vm4, %v1187_v36  ;;  %v1259_v42 = vpop.permute.xlu0 %1258 }
 0x309   : > { %1301 = vst.msk [vmem:[%s2114_s26 + $0x30] sm:$0xff] %vm1294_vm3, %v1259_v42 }
 0x30a   : > { %1318 = vst.msk [vmem:[%s2114_s26 + $0x30] sm:$0xff] %vm1311_vm4, %v1188_v38  ;;  %v1261_v44 = vpop.permute.xlu1 %1260 }
 0x30b   : > { %1302 = vst.msk [vmem:[%s2114_s26 + $0x38] sm:$0xff] %vm1294_vm3, %v1261_v44 }
 0x30c   : > { %1319 = vst.msk [vmem:[%s2114_s26 + $0x38] sm:$0xff] %vm1311_vm4, %v1189_v43  ;;  %v1263_v48 = vpop.permute.xlu0 %1262 }
 0x30d   : > { %1303 = vst.msk [vmem:[%s2114_s26 + $0x40] sm:$0xff] %vm1294_vm3, %v1263_v48 }
 0x30e   : > { %1320 = vst.msk [vmem:[%s2114_s26 + $0x40] sm:$0xff] %vm1311_vm4, %v1190_v33  ;;  %v1265_v53 = vpop.permute.xlu1 %1264 }
 0x30f   : > { %1304 = vst.msk [vmem:[%s2114_s26 + $0x48] sm:$0xff] %vm1294_vm3, %v1265_v53 }
 0x310   : > { %1321 = vst.msk [vmem:[%s2114_s26 + $0x48] sm:$0xff] %vm1311_vm4, %v1191_v49  ;;  %v1267_v39 = vpop.permute.xlu0 %1266 }
 0x311   : > { %1305 = vst.msk [vmem:[%s2114_s26 + $0x50] sm:$0xff] %vm1294_vm3, %v1267_v39 }
 0x312   : > { %1322 = vst.msk [vmem:[%s2114_s26 + $0x50] sm:$0xff] %vm1311_vm4, %v1192_v40  ;;  %v1269_v57 = vpop.permute.xlu1 %1268 }
 0x313   : > { %1306 = vst.msk [vmem:[%s2114_s26 + $0x58] sm:$0xff] %vm1294_vm3, %v1269_v57 }
 0x314   : > { %1323 = vst.msk [vmem:[%s2114_s26 + $0x58] sm:$0xff] %vm1311_vm4, %v1193_v55  ;;  %v1271_v46 = vpop.permute.xlu0 %1270 }
 0x315   : > { %1307 = vst.msk [vmem:[%s2114_s26 + $0x60] sm:$0xff] %vm1294_vm3, %v1271_v46 }
 0x316   : > { %1324 = vst.msk [vmem:[%s2114_s26 + $0x60] sm:$0xff] %vm1311_vm4, %v1194_v58  ;;  %v1273_v63 = vpop.permute.xlu1 %1272 }
 0x317   : > { %1308 = vst.msk [vmem:[%s2114_s26 + $0x68] sm:$0xff] %vm1294_vm3, %v1273_v63 }
 0x318   : > { %1325 = vst.msk [vmem:[%s2114_s26 + $0x68] sm:$0xff] %vm1311_vm4, %v1195_v60  ;;  %v1275_v1 = vpop.permute.xlu0 %1274 }
 0x319   : > { %1309 = vst.msk [vmem:[%s2114_s26 + $0x70] sm:$0xff] %vm1294_vm3, %v1275_v1 }
 0x31a   : > { %1326 = vst.msk [vmem:[%s2114_s26 + $0x70] sm:$0xff] %vm1311_vm4, %v1196_v0  ;;  %v1277_v52 = vpop.permute.xlu1 %1276 }
 0x31b   : > { %1310 = vst.msk [vmem:[%s2114_s26 + $0x78] sm:$0xff] %vm1294_vm3, %v1277_v52 }
 0x31c   : > { %1327 = vst.msk [vmem:[%s2114_s26 + $0x78] sm:$0xff] %vm1311_vm4, %v1197_v2 }
 0x31d   : > { %1756 = shalt.err (!%p1753_p3)
}
 0x31e   : > { %s1757_s21 = scalar_lea.hbm %s2327_s27, 2048  ;;  %s1761_s11 = scalar_lea.hbm %s2391_s10, 4096 }
 0x31f   : > { %p1758_p4 = scmp.ne.s32.totalorder %s2327_s27, %s1757_s21  ;;  %p1762_p9 = scmp.lt.s32.totalorder %s2327_s27, %s2391_s10 }
 0x320   : > { %p1763_p10 = scmp.lt.s32.totalorder %s1761_s11, %s1757_s21 }
 0x321   : > { %p1759_p7 = pnand %p1758_p4, %p1905_p5 }
 0x322   : > { %p1764_p11 = por %p1763_p10, %p1762_p9 }
 0x323   : > { %p1760_p8 = pneg %p1759_p7 }
 0x325   : > { %p1765_p12 = pnand %p1764_p11, %p1760_p8 }
 0x327   : > { %1768 = shalt.err (!%p1765_p12)
}
 0x328   : > { %s1808_s28 = smov 128  }
 0x329   : > { %1637 = dma.vmem_to_hbm [thread:$0]  (%p1905_p5), %s2332_s30, 2048, %s2327_s27, %s2340_s9, %s1808_s28, %s1808_s28, %s1806_s13  }
 0x32a PF: > { %p1643_p13 = scmp.ge.s32.totalorder %s1803_s18, 2  ;;  %s1357_s12 = sand.u32 1, %s1791_s15  }
 0x32b   : > { %s1358_s14 = scalar_lea.sflag [#allocation4], %s1357_s12 }
 0x32c   : > { %p1640_p0 = pnand %p1643_p13, %p1909_p6 }
 0x32e   : > { %p1641_p1 = pneg %p1640_p0 }
 0x330   : > { %1786 = dma.done.wait (%p1641_p1), %s1358_s14, 2048  }
 0x331   : > { %1788 = vsyncadd (%p1641_p1), %s1358_s14, 4294965248  ;;  %p21_p2 = scmp.ge.s32.totalorder %s1892_s20, 4   ;;  %s2394_s15 = smov %s1795_s16 }
 0x332   : > { %s2395_s16 = smov %s1799_s17  ;;  %s2396_s17 = smov %s1903_s23 }
 0x333   : > { %s2397_s18 = smov %s1892_s20  ;;  %23 = sbr.rel (!%p21_p2) target bundleno = 5 (0x5), region = 98 }
 0x338   :  { %1363 = vsyncpa [#allocation4], 1 }
 0x339   :  { %1365 = vsyncpa [#allocation4 + $0x1], 1 }

</bundles_post_ra>
